<compile_context>
chip_gen: v7x
topology: tpu7x:2x2x1
jax: 0.10.0
libtpu: 0.0.40
codegen_flags: <defaults>
</compile_context>

<pallas_src>
import jax
import jax.numpy as jnp
from jax import lax
from jax.experimental import pallas as pl
from jax.experimental.pallas import tpu as pltpu


HIDDEN_DIM = 20
CHUNK = 256      # lanes per inner chunk: (H, CHUNK) f32 intermediates ~6 vregs each
MAX_TM = 8192    # per-grid-step batch tile (lanes); large -> amortized step overhead


def _round_up(x, m):
    return ((x + m - 1) // m) * m


def pinn_kernel(t_ref, w1_ref, b1_ref, w2_ref, b2_ref, w3_ref, b3_ref, o_ref):
    # ---- hoisted once per grid step: weights / biases -----------------------
    w1 = w1_ref[...]          # (H, 1)
    b1 = b1_ref[...]          # (H, 1)
    w2 = w2_ref[...]          # (H, H)  layer-2 matmul operand (MXU)
    b2 = b2_ref[...]          # (H, 1)
    w3 = w3_ref[...]          # (H, 1)  == W3^T column
    b3 = b3_ref[0, 0]         # scalar, lives in SMEM

    tm = t_ref.shape[1]
    n_chunks = tm // CHUNK    # static

    def chunk(c, carry):
        start = pl.multiple_of(c * CHUNK, CHUNK)
        t = t_ref[:, pl.ds(start, CHUNK)]                          # (1, C)

        # Layer 1: Linear(1, H) + tanh.  K=1 -> outer-product broadcast on the
        # VPU, tanh on the EUP at full 128-lane occupancy.
        h1 = jnp.tanh(w1 * t + b1)                                 # (H, C)

        # Layer 2: Linear(H, H) + tanh.  The only real matmul: W2[H,H] @ h1[H,C]
        # on the MXU with the lane-wide batch chunk as the free dimension.
        z2 = jnp.dot(w2, h1, preferred_element_type=jnp.float32) + b2
        h2 = jnp.tanh(z2)                                          # (H, C)

        # Layer 3: Linear(H, 1).  N=1 -> multiply + sublane reduce (VPU + XLU).
        y = jnp.sum(w3 * h2, axis=0, keepdims=True) + b3           # (1, C)

        o_ref[:, pl.ds(start, CHUNK)] = y.astype(o_ref.dtype)
        return carry

    lax.fori_loop(0, n_chunks, chunk, 0, unroll=2)


def pinn_forward(t, params, *, tm=None):
    """t: [N, 1] float32.  params: w1(H,1), b1(H,1), w2(H,H), b2(H,1), w3(H,1), b3(1,1)."""
    N = t.shape[0]
    H = params["w2"].shape[0]

    # ---- choose the lane-dense batch tile tm and pad N up to G * tm ---------
    if tm is None:
        if N <= MAX_TM:
            Np = _round_up(max(N, 1), CHUNK)
            if Np >= 2 * CHUNK and (Np // 2) % CHUNK == 0:
                tm = Np // 2          # G = 2: keeps both v7x TensorCores busy
            else:
                tm = Np               # single grid step
        else:
            tm = MAX_TM
            Np = _round_up(N, tm)     # G >= 2 automatically
    else:
        assert tm % CHUNK == 0, "tm must be a multiple of the lane-chunk size"
        Np = _round_up(max(N, 1), tm)
    G = Np // tm

    t = t.astype(jnp.float32)
    t_pad = t if Np == N else jnp.pad(t, ((0, Np - N), (0, 0)))
    t3 = t_pad.reshape(G, 1, tm)      # batch occupies the last (128-lane) axis

    in_specs = [
        pl.BlockSpec((None, 1, tm), lambda i: (i, 0, 0)),    # t tile (lead dim squeezed)
        pl.BlockSpec((H, 1), lambda i: (0, 0)),              # w1 column  [H, 1]
        pl.BlockSpec((H, 1), lambda i: (0, 0)),              # b1 column  [H, 1]
        pl.BlockSpec((H, H), lambda i: (0, 0)),              # W2 (out, in)
        pl.BlockSpec((H, 1), lambda i: (0, 0)),              # b2 column  [H, 1]
        pl.BlockSpec((H, 1), lambda i: (0, 0)),              # w3 column  [H, 1] (= W3^T)
        pl.BlockSpec(memory_space=pltpu.MemorySpace.SMEM),   # b3 scalar in SMEM
    ]
    out_spec = pl.BlockSpec((None, 1, tm), lambda i: (i, 0, 0))

    cost = pl.CostEstimate(
        flops=2 * Np * (H + H * H + H),
        transcendentals=2 * H * Np,
        bytes_accessed=4 * (2 * Np + H * H + 4 * H + 1),
    )

    out3 = pl.pallas_call(
        pinn_kernel,
        out_shape=jax.ShapeDtypeStruct((G, 1, tm), jnp.float32),
        grid_spec=pltpu.PrefetchScalarGridSpec(
            num_scalar_prefetch=0,
            grid=(G,),
            in_specs=in_specs,
            out_specs=out_spec,
        ),
        compiler_params=pltpu.CompilerParams(
            # Grid steps are independent over the batch; on v7x (2 TCs) this
            # shards the steps across cores, on v5e/v6e it is a plain loop.
            dimension_semantics=("parallel",)
        ),
        cost_estimate=cost,
    )(
        t3,
        params["w1"], params["b1"],
        params["w2"], params["b2"],
        params["w3"], params["b3"],
    )
    return out3.reshape(Np, 1)[:N]


def init_params(key, hidden_dim=HIDDEN_DIM):
    """PyTorch nn.Linear-style init: U(-1/sqrt(fan_in), 1/sqrt(fan_in)).
    Weights stored in (out, in) torch convention; biases as columns; w3 stored
    transposed as a column so the kernel can do a broadcast-multiply + reduce."""
    keys = jax.random.split(key, 6)

    def lin(kw, kb, fan_in, fan_out):
        bound = 1.0 / jnp.sqrt(fan_in)
        w = jax.random.uniform(kw, (fan_out, fan_in), jnp.float32, -bound, bound)
        b = jax.random.uniform(kb, (fan_out, 1), jnp.float32, -bound, bound)
        return w, b

    w1, b1 = lin(keys[0], keys[1], 1, hidden_dim)            # (H,1), (H,1)
    w2, b2 = lin(keys[2], keys[3], hidden_dim, hidden_dim)   # (H,H), (H,1)
    w3, b3 = lin(keys[4], keys[5], hidden_dim, 1)            # (1,H), (1,1)
    return {"w1": w1, "b1": b1, "w2": w2, "b2": b2, "w3": w3.T, "b3": b3}


def reference_forward(t, p):
    """Pure-JAX reference with PyTorch Linear semantics (x @ W.T + b)."""
    h1 = jnp.tanh(t @ p["w1"].T + p["b1"].T)                 # (N, H)
    h2 = jnp.tanh(h1 @ p["w2"].T + p["b2"].T)                # (N, H)
    return h2 @ p["w3"] + p["b3"]                            # (N, 1)


if __name__ == "__main__":
    key = jax.random.PRNGKey(0)
    k_param, k_t = jax.random.split(key)

    params = init_params(k_param, HIDDEN_DIM)
    # N deliberately not a multiple of 128: exercises the padding path,
    # a 2-step ("parallel") grid, and the inner lane-chunk loop.
    N = 1000
    t = jax.random.uniform(k_t, (N, 1), jnp.float32, 0.0, 2.0)

    out = jax.block_until_ready(pinn_forward(t, params))

    ref = reference_forward(t, params)
    assert out.shape == (N, 1)
    err = float(jnp.max(jnp.abs(out - ref)))
    assert err < 1e-4, f"mismatch vs reference: {err}"

    print("KERNEL_OK")
</pallas_src>

<mosaic_0001>
module attributes {stable_mosaic.version = 11 : i64} {
  func.func @pinn_kernel(%arg0: i32, %arg1: memref<1x1x512xf32, #tpu.memory_space<vmem>>, %arg2: memref<20x1xf32, #tpu.memory_space<vmem>>, %arg3: memref<20x1xf32, #tpu.memory_space<vmem>>, %arg4: memref<20x20xf32, #tpu.memory_space<vmem>>, %arg5: memref<20x1xf32, #tpu.memory_space<vmem>>, %arg6: memref<20x1xf32, #tpu.memory_space<vmem>>, %arg7: memref<1x1xf32, #tpu.memory_space<smem>>, %arg8: memref<1x1x512xf32, #tpu.memory_space<vmem>>) attributes {dimension_semantics = [#tpu.dimension_semantics<parallel>], iteration_bounds = array<i64: 2>, scalar_prefetch = 0 : i64, scratch_operands = 0 : i64, tpu.core_type = #tpu.core_type<tc>, window_params = [{transform_indices = @transform_0, window_bounds = array<i64: 1, 1, 512>}, {pipeline_mode = #tpu.pipeline_mode<synchronous>, transform_indices = @transform_1, window_bounds = array<i64: 20, 1>}, {pipeline_mode = #tpu.pipeline_mode<synchronous>, transform_indices = @transform_2, window_bounds = array<i64: 20, 1>}, {pipeline_mode = #tpu.pipeline_mode<synchronous>, transform_indices = @transform_3, window_bounds = array<i64: 20, 20>}, {pipeline_mode = #tpu.pipeline_mode<synchronous>, transform_indices = @transform_4, window_bounds = array<i64: 20, 1>}, {pipeline_mode = #tpu.pipeline_mode<synchronous>, transform_indices = @transform_5, window_bounds = array<i64: 20, 1>}, {transform_indices = @transform_6, window_bounds = array<i64: 1, 1>}, {transform_indices = @transform_7, window_bounds = array<i64: 1, 1, 512>}]} {
    %c0 = arith.constant 0 : index
    %c0_0 = arith.constant 0 : index
    %0 = vector.load %arg2[%c0, %c0_0] : memref<20x1xf32, #tpu.memory_space<vmem>>, vector<20x1xf32>
    %c0_1 = arith.constant 0 : index
    %c0_2 = arith.constant 0 : index
    %1 = vector.load %arg3[%c0_1, %c0_2] : memref<20x1xf32, #tpu.memory_space<vmem>>, vector<20x1xf32>
    %c0_3 = arith.constant 0 : index
    %c0_4 = arith.constant 0 : index
    %2 = vector.load %arg4[%c0_3, %c0_4] : memref<20x20xf32, #tpu.memory_space<vmem>>, vector<20x20xf32>
    %c0_5 = arith.constant 0 : index
    %c0_6 = arith.constant 0 : index
    %3 = vector.load %arg5[%c0_5, %c0_6] : memref<20x1xf32, #tpu.memory_space<vmem>>, vector<20x1xf32>
    %c0_7 = arith.constant 0 : index
    %c0_8 = arith.constant 0 : index
    %4 = vector.load %arg6[%c0_7, %c0_8] : memref<20x1xf32, #tpu.memory_space<vmem>>, vector<20x1xf32>
    %c0_9 = arith.constant 0 : index
    %c0_10 = arith.constant 0 : index
    %5 = memref.load %arg7[%c0_9, %c0_10] : memref<1x1xf32, #tpu.memory_space<smem>>
    %c0_i32 = arith.constant 0 : i32
    %c256_i32 = arith.constant 256 : i32
    %6 = arith.muli %c0_i32, %c256_i32 : i32
    %7 = tpu.assume_multiple %6, 256 : i32
    %c0_11 = arith.constant 0 : index
    %c0_12 = arith.constant 0 : index
    %8 = arith.index_cast %7 : i32 to index
    %9 = vector.load %arg1[%c0_11, %c0_12, %8] : memref<1x1x512xf32, #tpu.memory_space<vmem>>, vector<1x1x256xf32>
    %10 = vector.shape_cast %9 : vector<1x1x256xf32> to vector<1x256xf32>
    %11 = vector.broadcast %0 : vector<20x1xf32> to vector<20x256xf32>
    %12 = vector.broadcast %10 : vector<1x256xf32> to vector<20x256xf32>
    %13 = arith.mulf %11, %12 : vector<20x256xf32>
    %14 = vector.broadcast %1 : vector<20x1xf32> to vector<20x256xf32>
    %15 = arith.addf %13, %14 : vector<20x256xf32>
    %16 = math.tanh %15 : vector<20x256xf32>
    %cst = arith.constant dense<0.000000e+00> : vector<20x256xf32>
    %17 = tpu.matmul %2, %16, %cst {dimension_numbers = #tpu.dot_dimension_numbers<[1], [0], [0], [1], [0, 0, 1, 1], [], []>} : vector<20x20xf32>, vector<20x256xf32>, vector<20x256xf32> -> vector<20x256xf32>
    %18 = vector.broadcast %3 : vector<20x1xf32> to vector<20x256xf32>
    %19 = arith.addf %17, %18 : vector<20x256xf32>
    %20 = math.tanh %19 : vector<20x256xf32>
    %21 = vector.broadcast %4 : vector<20x1xf32> to vector<20x256xf32>
    %22 = arith.mulf %21, %20 : vector<20x256xf32>
    %cst_13 = arith.constant dense<0.000000e+00> : vector<256xf32>
    %23 = vector.multi_reduction <add>, %22, %cst_13 [0] : vector<20x256xf32> to vector<256xf32>
    %24 = vector.shape_cast %23 : vector<256xf32> to vector<1x256xf32>
    %25 = vector.broadcast %5 : f32 to vector<1x256xf32>
    %26 = arith.addf %24, %25 : vector<1x256xf32>
    %c0_14 = arith.constant 0 : index
    %c0_15 = arith.constant 0 : index
    %27 = arith.index_cast %7 : i32 to index
    %28 = vector.load %arg8[%c0_14, %c0_15, %27] : memref<1x1x512xf32, #tpu.memory_space<vmem>>, vector<1x1x256xf32>
    %29 = vector.shape_cast %28 : vector<1x1x256xf32> to vector<1x256xf32>
    %30 = vector.shape_cast %26 : vector<1x256xf32> to vector<1x1x256xf32>
    tpu.vector_store %arg8[%c0_14, %c0_15, %27], %30 {strides = array<i32>} : memref<1x1x512xf32, #tpu.memory_space<vmem>>, vector<1x1x256xf32>,
    %c1_i32 = arith.constant 1 : i32
    %c256_i32_16 = arith.constant 256 : i32
    %31 = arith.muli %c1_i32, %c256_i32_16 : i32
    %32 = tpu.assume_multiple %31, 256 : i32
    %c0_17 = arith.constant 0 : index
    %c0_18 = arith.constant 0 : index
    %33 = arith.index_cast %32 : i32 to index
    %34 = vector.load %arg1[%c0_17, %c0_18, %33] : memref<1x1x512xf32, #tpu.memory_space<vmem>>, vector<1x1x256xf32>
    %35 = vector.shape_cast %34 : vector<1x1x256xf32> to vector<1x256xf32>
    %36 = vector.broadcast %0 : vector<20x1xf32> to vector<20x256xf32>
    %37 = vector.broadcast %35 : vector<1x256xf32> to vector<20x256xf32>
    %38 = arith.mulf %36, %37 : vector<20x256xf32>
    %39 = vector.broadcast %1 : vector<20x1xf32> to vector<20x256xf32>
    %40 = arith.addf %38, %39 : vector<20x256xf32>
    %41 = math.tanh %40 : vector<20x256xf32>
    %cst_19 = arith.constant dense<0.000000e+00> : vector<20x256xf32>
    %42 = tpu.matmul %2, %41, %cst_19 {dimension_numbers = #tpu.dot_dimension_numbers<[1], [0], [0], [1], [0, 0, 1, 1], [], []>} : vector<20x20xf32>, vector<20x256xf32>, vector<20x256xf32> -> vector<20x256xf32>
    %43 = vector.broadcast %3 : vector<20x1xf32> to vector<20x256xf32>
    %44 = arith.addf %42, %43 : vector<20x256xf32>
    %45 = math.tanh %44 : vector<20x256xf32>
    %46 = vector.broadcast %4 : vector<20x1xf32> to vector<20x256xf32>
    %47 = arith.mulf %46, %45 : vector<20x256xf32>
    %cst_20 = arith.constant dense<0.000000e+00> : vector<256xf32>
    %48 = vector.multi_reduction <add>, %47, %cst_20 [0] : vector<20x256xf32> to vector<256xf32>
    %49 = vector.shape_cast %48 : vector<256xf32> to vector<1x256xf32>
    %50 = vector.broadcast %5 : f32 to vector<1x256xf32>
    %51 = arith.addf %49, %50 : vector<1x256xf32>
    %c0_21 = arith.constant 0 : index
    %c0_22 = arith.constant 0 : index
    %52 = arith.index_cast %32 : i32 to index
    %53 = vector.load %arg8[%c0_21, %c0_22, %52] : memref<1x1x512xf32, #tpu.memory_space<vmem>>, vector<1x1x256xf32>
    %54 = vector.shape_cast %53 : vector<1x1x256xf32> to vector<1x256xf32>
    %55 = vector.shape_cast %51 : vector<1x256xf32> to vector<1x1x256xf32>
    tpu.vector_store %arg8[%c0_21, %c0_22, %52], %55 {strides = array<i32>} : memref<1x1x512xf32, #tpu.memory_space<vmem>>, vector<1x1x256xf32>,
    %c2_i32 = arith.constant 2 : i32
    return
  }
  func.func @transform_0(%arg0: i32) -> (i32, i32, i32) {
    %c0_i32 = arith.constant 0 : i32
    %c0_i32_0 = arith.constant 0 : i32
    %c0_i32_1 = arith.constant 0 : i32
    return %arg0, %c0_i32, %c0_i32_0 : i32, i32, i32
  }
  func.func @transform_1(%arg0: i32) -> (i32, i32) {
    %c0_i32 = arith.constant 0 : i32
    %c0_i32_0 = arith.constant 0 : i32
    %c0_i32_1 = arith.constant 0 : i32
    return %c0_i32, %c0_i32_0 : i32, i32
  }
  func.func @transform_2(%arg0: i32) -> (i32, i32) {
    %c0_i32 = arith.constant 0 : i32
    %c0_i32_0 = arith.constant 0 : i32
    %c0_i32_1 = arith.constant 0 : i32
    return %c0_i32, %c0_i32_0 : i32, i32
  }
  func.func @transform_3(%arg0: i32) -> (i32, i32) {
    %c0_i32 = arith.constant 0 : i32
    %c0_i32_0 = arith.constant 0 : i32
    %c0_i32_1 = arith.constant 0 : i32
    return %c0_i32, %c0_i32_0 : i32, i32
  }
  func.func @transform_4(%arg0: i32) -> (i32, i32) {
    %c0_i32 = arith.constant 0 : i32
    %c0_i32_0 = arith.constant 0 : i32
    %c0_i32_1 = arith.constant 0 : i32
    return %c0_i32, %c0_i32_0 : i32, i32
  }
  func.func @transform_5(%arg0: i32) -> (i32, i32) {
    %c0_i32 = arith.constant 0 : i32
    %c0_i32_0 = arith.constant 0 : i32
    %c0_i32_1 = arith.constant 0 : i32
    return %c0_i32, %c0_i32_0 : i32, i32
  }
  func.func @transform_6(%arg0: i32) -> (i32, i32) {
    %c0_i32 = arith.constant 0 : i32
    %c0_i32_0 = arith.constant 0 : i32
    %c0_i32_1 = arith.constant 0 : i32
    return %c0_i32, %c0_i32_0 : i32, i32
  }
  func.func @transform_7(%arg0: i32) -> (i32, i32, i32) {
    %c0_i32 = arith.constant 0 : i32
    %c0_i32_0 = arith.constant 0 : i32
    %c0_i32_1 = arith.constant 0 : i32
    return %arg0, %c0_i32, %c0_i32_0 : i32, i32, i32
  }
}

</mosaic_0001>

<bundles_post_ra>
// kernel: tpu_custom_call.1
= control target key start
LH: loop header
LB: loop body
LE: loop exit
PB: predicated region body
PF: predicated region fallthrough
CT: control target
= control target key end

     0   :  { %s1194_s0 = inlined_call_operand.vmem [shape: f32[2,1,512], index: 0, kind: input, shape index: {}]   ;;  %s1195_s1 = inlined_call_operand.vmem [shape: f32[20,1], index: 1, kind: input, shape index: {}]   ;;  %s1196_s2 = inlined_call_operand.vmem [shape: f32[20,1], index: 2, kind: input, shape index: {}]   ;;  %s1197_s3 = inlined_call_operand.vmem [shape: f32[20,20], index: 3, kind: input, shape index: {}]   ;;  %s1198_s4 = inlined_call_operand.vmem [shape: f32[20,1], index: 4, kind: input, shape index: {}]   ;;  %s1199_s5 = inlined_call_operand.vmem [shape: f32[20,1], index: 5, kind: input, shape index: {}]   ;;  %s1200_s6 = inlined_call_operand.<no memory space> [shape: f32[1,1], index: 6, kind: input, shape index: {}]   ;;  %s1201_s7 = inlined_call_operand.hbm [shape: f32[2,1,512], index: 7, kind: output, shape index: {}]  }
   0x1   :  { %12 = sst [smem:[#allocation2]] %s1200_s6 }
   0x2   :  { %13 = vsyncpa [#allocation4], 0 }
   0x3   :  { %15 = vsyncpa [#allocation4 + $0x1], 0  ;;  %s1018_s26 = smov 0   ;;  %s1020_s27 = smov 0  }
   0x4   :  { %s1022_s28 = smov 0   ;;  %s1024_s29 = smov 0  }
   0x5 LB: > { %s1039_s6 = sadd.s32 4294967295, %s969_s29   ;;  %s783_s30 = sadd.s32 4294967294, %s969_s29   ;;  %s969_s29 = sphi %s1024_s29, %s1207_s29   ;;  %s965_s28 = sphi %s1022_s28, %s1206_s28   ;;  %s961_s27 = sphi %s1020_s27, %s1205_s27   ;;  %s957_s26 = sphi %s1018_s26, %s1204_s26  }
   0x6   : > { %s1043_s8 = sadd.s32 1, %s969_s29   ;;  %s180_s9 = sadd.s32 1, %s965_s28 }
   0x7   : > { %s177_s10 = ssub.s32 %s969_s29, %s1043_s8  ;;  %p190_p0 = scmp.ne.s32.totalorder %s965_s28, %s961_s27 }
   0x8   : > { %p178_p1 = scmp.eq.s32.totalorder %s177_s10, 0  ;;  %p191_p2 = scmp.eq.s32.totalorder %s1039_s6, 1 }
   0x9   : > { %p196_p3 = scmp.ne.s32.totalorder %s961_s27, %s957_s26  ;;  %p197_p4 = scmp.eq.s32.totalorder %s783_s30, 1 }
   0xa   : > { %s1054_s11 = scalar_select %p178_p1, %s965_s28, %s180_s9  }
   0xb   : > { %p1056_p5 = por %p191_p2, %p190_p0  ;;  %p1060_p6 = por %p197_p4, %p196_p3 }
   0xc   : > { %p786_p7 = scmp.ge.s32.totalorder %s969_s29, 1  ;;  %p240_p8 = scmp.lt.s32.totalorder %s969_s29, 3 }
   0xe   : > { %p241_p9 = pnand %p786_p7, %p240_p8 }
   0xf   : > { %v278_v0 = vld [vmem:[%s1196_s2] sm:$0xff] (!%p241_p9)  ;;  %v971_v2 = vmov (!%p241_p9), 0   ;;  %v279_v3 = vld [vmem:[%s1196_s2 + $0x8] sm:$0xff] (!%p241_p9)  ;;  %v280_v5 = vld [vmem:[%s1196_s2 + $0x10] sm:$0xf] (!%p241_p9)  ;;  %v972_v13 = vmov (!%p241_p9), 0.0   ;;  %v308_v14 = vlaneseq (!%p241_p9) }
  0x10   : > { %244 = sbr.rel (%p241_p9) target bundleno = 448 (0x1c0), region = 48  ;;  %v275_v1 = vld [vmem:[%s1195_s1] sm:$0xff] (!%p241_p9)  ;;  %858 = vset.pattern.permute.xlu1 (!%p241_p9), %v971_v2  ;;  %857 = vset.pattern.permute.xlu0 (!%p241_p9), %v971_v2  ;;  %v276_v4 = vld [vmem:[%s1195_s1 + $0x8] sm:$0xff] (!%p241_p9)  ;;  %v277_v6 = vld [vmem:[%s1195_s1 + $0x10] sm:$0xf] (!%p241_p9)  ;;  %p271_p10 = scmp.lt.s32.totalorder (!%p241_p9), %s1039_s6, 1 }
  0x11   : > { %326 = vperm.xlu1 (!%p241_p9), %858, %v278_v0   ;;  %294 = vperm.xlu0 (!%p241_p9), %857, %v275_v1   ;;  %v285_v7 = vld [vmem:[%s1198_s4 + $0x8] sm:$0xff] (!%p241_p9)  ;;  %v284_v8 = vld [vmem:[%s1198_s4] sm:$0xff] (!%p241_p9)  ;;  %v286_v10 = vld [vmem:[%s1198_s4 + $0x10] sm:$0xf] (!%p241_p9)  ;;  %v1107_v15 = vshrl.u32 (!%p241_p9), %v308_v14, 7  ;;  %vm376_vm0 = vcmask (!%p241_p9), 1043456  }
  0x12   : > { %v287_v9 = vld [vmem:[%s1199_s5] sm:$0xff] (!%p241_p9)  ;;  %v289_v11 = vld [vmem:[%s1199_s5 + $0x10] sm:$0xf] (!%p241_p9)  ;;  %v288_v12 = vld [vmem:[%s1199_s5 + $0x8] sm:$0xff] (!%p241_p9)  ;;  %447 = vmatprep.mubr.f32.mxu0 (!%p241_p9), %v972_v13  ;;  %638 = vmatprep.mubr.f32.mxu1 (!%p241_p9), %v972_v13  ;;  %vm366_vm1 = vcmask (!%p241_p9), 162816   ;;  %s290_s19 = sld [smem:[#allocation2]] (!%p241_p9) }
  0x13   : > { %v310_v16 = vsub.s32 (!%p241_p9), 0, %v1107_v15  ;;  %v314_v17 = vsub.s32 (!%p241_p9), 1, %v1107_v15  ;;  %s268_s20 = sand.u32 (!%p241_p9), 1, %s961_s27   ;;  %vm534_vm2 = vcmp.lt.s32.totalorder (!%p241_p9), %v308_v14, 256  ;;  %s806_s22 = sshll.u32 (!%p241_p9), %s1039_s6, 6 }
  0x14   : > { %s787_s21 = sshll.u32 (!%p241_p9), %s268_s20, 2  ;;  %s710_s10 = scalar_lea.sflag (!%p241_p9), [#allocation4], %s268_s20 }
  0x15   : > { %331 = vperm.xlu1 (!%p241_p9), %858, %v279_v3   ;;  %299 = vperm.xlu0 (!%p241_p9), %857, %v276_v4   ;;  %v281_v4 = vld [vmem:[%s1197_s3] sm:$0xff] (!%p241_p9)  ;;  %s974_s14 = smov (!%p241_p9), [#allocation3]  }
  0x16   : > { %s911_s15 = sshll.u32 (!%p241_p9), %s974_s14, 4  ;;  %s912_s15 = int_to_ptr.vmem [resolvable:$false] %s911_s15 }
  0x17   : > { %s272_s23 = scalar_select %p271_p10, %s1039_s6, 1 }
  0x18   : > { %s913_s16 = scalar_lea.vmem %s912_s15, 128 }
  0x19   : > { %336 = vperm.xlu1 %858, %v280_v5   ;;  %304 = vperm.xlu0 %857, %v277_v6   ;;  %s788_s24 = sshll.u32 %s272_s23, 2  ;;  %s270_s23 = scalar_lea.vmem [#allocation3], %s787_s21 }
  0x1a   : > { %s274_s9 = scalar_lea.vmem %s1194_s0, %s788_s24  ;;  %s724_s24 = sshll.u32 %s270_s23, 4  ;;  %s1152_s24 = int_to_ptr.vmem [resolvable:$true] %s724_s24 }
  0x1b   : > { %v291_v18 = vld [vmem:[%s274_s9] sm:$0x3]  ;;  %v794_v19 = vld [vmem:[%s274_s9 + $0x2] sm:$0x3]  ;;  %s1150_s9 = scalar_lea.hbm %s1201_s7, %s806_s22  ;;  %s907_s6 = scalar_lea.vmem %s1152_s24, 64 }
  0x1c   : > { %v311_v20 = vrot.slane %v291_v18, %v310_v16  ;;  %v315_v21 = vrot.slane %v291_v18, %v314_v17  ;;  %v543_v22 = vrot.slane %v794_v19, %v310_v16  ;;  %v547_v23 = vrot.slane %v794_v19, %v314_v17  ;;  %p908_p11 = scmp.ne.s32.totalorder %s1152_s24, %s907_s6  ;;  %p914_p0 = scmp.lt.s32.totalorder %s1152_s24, %s912_s15 }
  0x1d   : > { %358 = vperm.xlu1 %858, %v285_v7   ;;  %353 = vperm.xlu0 %857, %v284_v8   ;;  %v282_v7 = vld [vmem:[%s1197_s3 + $0x8] sm:$0xff]  ;;  %v283_v8 = vld [vmem:[%s1197_s3 + $0x10] sm:$0xf]  ;;  %p915_p1 = scmp.lt.s32.totalorder %s913_s16, %s907_s6 }
  0x1e   : > { %p909_p12 = pnand %p908_p11, %p1056_p5 }
  0x1f   : > { %p916_p2 = por %p915_p1, %p914_p0 }
  0x20   : > { %p910_p13 = pneg %p909_p12 }
  0x21   : > { %474 = vperm.xlu1 %858, %v287_v9   ;;  %363 = vperm.xlu0 %857, %v286_v10  }
  0x22   : > { %p917_p3 = pnand %p916_p2, %p910_p13 }
  0x25   : > { %484 = vperm.xlu1 %858, %v289_v11   ;;  %479 = vperm.xlu0 %857, %v288_v12  }
  0x90   : > { %v327_v24 = vpop.permute.xlu1 %326  ;;  %v295_v25 = vpop.permute.xlu0 %294 }
  0x91   : > { %v318_v26 = vmul.f32 %v311_v20, %v295_v25  ;;  %v319_v27 = vmul.f32 %v315_v21, %v295_v25  ;;  %v550_v28 = vmul.f32 %v543_v22, %v295_v25  ;;  %v551_v29 = vmul.f32 %v547_v23, %v295_v25 }
  0x93   : > { %v339_v30 = vadd.f32 %v327_v24, %v318_v26  ;;  %v340_v31 = vadd.f32 %v327_v24, %v319_v27  ;;  %v556_v32 = vadd.f32 %v550_v28, %v327_v24  ;;  %v557_v33 = vadd.f32 %v551_v29, %v327_v24 }
  0x94   : > { %v332_v34 = vpop.permute.xlu1 %331  ;;  %v300_v35 = vpop.permute.xlu0 %299 }
  0x95   : > { %859 = vtanh.f32 %v339_v30  ;;  %v320_v36 = vmul.f32 %v311_v20, %v300_v35  ;;  %v321_v37 = vmul.f32 %v315_v21, %v300_v35  ;;  %v552_v38 = vmul.f32 %v543_v22, %v300_v35 }
  0x96   : > { %861 = vtanh.f32 %v340_v31  ;;  %v553_v39 = vmul.f32 %v547_v23, %v300_v35 }
  0x97   : > { %863 = vtanh.f32 %v556_v32  ;;  %v341_v40 = vadd.f32 %v332_v34, %v320_v36  ;;  %v342_v41 = vadd.f32 %v332_v34, %v321_v37  ;;  %v558_v42 = vadd.f32 %v552_v38, %v332_v34 }
  0x98   : > { %865 = vtanh.f32 %v557_v33  ;;  %v559_v43 = vadd.f32 %v553_v39, %v332_v34  ;;  %v305_v44 = vpop.permute.xlu0 %304  ;;  %v337_v47 = vpop.permute.xlu1 %336 }
  0x99   : > { %867 = vtanh.f32 %v341_v40  ;;  %v322_v45 = vmul.f32 %v311_v20, %v305_v44  ;;  %v323_v46 = vmul.f32 %v315_v21, %v305_v44  ;;  %v555_v48 = vmul.f32 %v547_v23, %v305_v44 }
  0x9a   : > { %869 = vtanh.f32 %v342_v41  ;;  %v554_v50 = vmul.f32 %v543_v22, %v305_v44 }
  0x9b   : > { %871 = vtanh.f32 %v558_v42  ;;  %v344_v49 = vadd.f32 %v337_v47, %v323_v46  ;;  %v561_v51 = vadd.f32 %v555_v48, %v337_v47  ;;  %v343_v52 = vadd.f32 %v337_v47, %v322_v45 }
  0x9c   : > { %873 = vtanh.f32 %v559_v43  ;;  %v560_v54 = vadd.f32 %v554_v50, %v337_v47  ;;  %v354_v9 = vpop.permute.xlu0 %353  ;;  %v359_v20 = vpop.permute.xlu1 %358 }
  0x9d   : > { %875 = vtanh.f32 %v344_v49 }
  0x9e   : > { %877 = vtanh.f32 %v561_v51 }
  0x9f   : > { %v860_v53 = vpop.eup %859  ;;  %879 = vtanh.f32 %v343_v52 }
  0xa0   : > { %v862_v55 = vpop.eup %861  ;;  %881 = vtanh.f32 %v560_v54  ;;  %v364_v28 = vpop.permute.xlu0 %363 }
  0xa1   : > { %v864_v56 = vpop.eup %863  ;;  %v475_v41 = vpop.permute.xlu1 %474 }
  0xa2   : > { %v866_v57 = vpop.eup %865 }
  0xa3   : > { %v868_v58 = vpop.eup %867 }
  0xa4   : > { %v870_v59 = vpop.eup %869  ;;  %v809_v60 = vpack.c.bf16 %v868_v58, %v860_v53  ;;  %v480_v44 = vpop.permute.xlu0 %479 }
  0xa5   : > { %v872_v61 = vpop.eup %871  ;;  %v807_v62 = vpack.c.bf16 %v870_v59, %v862_v55 }
  0xa6   : > { %v874_v63 = vpop.eup %873  ;;  %v813_v0 = vpack.c.bf16 %v872_v61, %v864_v56  ;;  %v485_v56 = vpop.permute.xlu1 %484 }
  0xa7   : > { %808 = vmatprep.subr.bf16.mxu0 %v807_v62  ;;  %v811_v1 = vpack.c.bf16 %v874_v63, %v866_v57  ;;  %v876_v2 = vpop.eup %875 }
  0xa8   : > { %810 = vmatpush1.bf16.msra.mxu0 %v809_v60  ;;  %v878_v3 = vpop.eup %877 }
  0xa9   : > { %812 = vmatprep.subr.bf16.mxu1 %v811_v1  ;;  %789 = vmatprep.subr.msk.mxu0 %vm376_vm0, %v876_v2  ;;  %v880_v5 = vpop.eup %879 }
  0xaa   : > { %814 = vmatpush1.bf16.msra.mxu1 %v813_v0  ;;  %v882_v6 = vpop.eup %881 }
  0xab   : > { %795 = vmatprep.subr.msk.mxu1 %vm376_vm0, %v878_v3 }
  0xac   : > { %790 = vmatpush1.msk.msra.mxu0 %vm376_vm0, %v880_v5 }
  0xad   : > { %791 = vmatmul.mubr.msk.f32.vlgmr.msra.gmra.mrb[0].mxu0 %vm366_vm1, %v281_v4 }
  0xae   : > { %796 = vmatpush1.msk.msra.mxu1 %vm376_vm0, %v882_v6  ;;  %453 = vmatprep.mubr.f32.mxu0 %v972_v13 }
  0xaf   : > { %797 = vmatmul.mubr.msk.f32.vlgmr.msra.gmra.mrb[0].mxu1 %vm366_vm1, %v281_v4 }
  0xb0   : > { %644 = vmatprep.mubr.f32.mxu1 %v972_v13 }
  0xb1   : > { %792 = vmatmul.mubr.msk.f32.gmra.mrb[2].mxu0 %vm366_vm1, %v282_v7 }
  0xb2   : > { %459 = vmatprep.mubr.f32.mxu0 %v972_v13 }
  0xb3   : > { %798 = vmatmul.mubr.msk.f32.gmra.mrb[2].mxu1 %vm366_vm1, %v282_v7 }
  0xb4   : > { %650 = vmatprep.mubr.f32.mxu1 %v972_v13 }
  0xb5   : > { %793 = vmatmul.mubr.msk.f32.gmra.mrb[4].mxu0 %vm366_vm1, %v283_v8 }
  0xb7   : > { %799 = vmatmul.mubr.msk.f32.gmra.mrb[4].mxu1 %vm366_vm1, %v283_v8 }
 0x180   : > { %v449_v10 = vpop.f32.mrb[0].mxu0 }
 0x181   : > { %v450_v11 = vadd.f32 %v449_v10, %v354_v9  ;;  %v451_v12 = vpop.f32.mrb[1].mxu0 }
 0x182   : > { %v640_v16 = vpop.f32.mrb[0].mxu1  ;;  %v452_v17 = vadd.f32 %v451_v12, %v354_v9 }
 0x183   : > { %883 = vtanh.f32 %v450_v11  ;;  %v641_v18 = vadd.f32 %v640_v16, %v354_v9  ;;  %v642_v19 = vpop.f32.mrb[1].mxu1 }
 0x184   : > { %885 = vtanh.f32 %v452_v17  ;;  %v643_v21 = vadd.f32 %v642_v19, %v354_v9  ;;  %v455_v22 = vpop.f32.mrb[2].mxu0 }
 0x185   : > { %887 = vtanh.f32 %v641_v18  ;;  %v456_v23 = vadd.f32 %v455_v22, %v359_v20  ;;  %v457_v13 = vpop.f32.mrb[3].mxu0 }
 0x186   : > { %889 = vtanh.f32 %v643_v21  ;;  %v646_v24 = vpop.f32.mrb[2].mxu1  ;;  %v458_v25 = vadd.f32 %v457_v13, %v359_v20 }
 0x187   : > { %891 = vtanh.f32 %v456_v23  ;;  %v647_v26 = vadd.f32 %v646_v24, %v359_v20  ;;  %v648_v27 = vpop.f32.mrb[3].mxu1 }
 0x188   : > { %893 = vtanh.f32 %v458_v25  ;;  %v649_v29 = vadd.f32 %v648_v27, %v359_v20  ;;  %v461_v30 = vpop.f32.mrb[4].mxu0  ;;  %v973_v25 = vmov 1966171168  }
 0x189   : > { %895 = vtanh.f32 %v647_v26  ;;  %v462_v31 = vadd.f32 %v461_v30, %v364_v28  ;;  %v463_v32 = vpop.f32.mrb[5].mxu0  ;;  %v518_v26 = vunpack.c.l.s4 %v973_v25 }
 0x18a   : > { %897 = vtanh.f32 %v649_v29  ;;  %v652_v33 = vpop.f32.mrb[4].mxu1  ;;  %v464_v34 = vadd.f32 %v463_v32, %v364_v28 }
 0x18b   : > { %899 = vtanh.f32 %v462_v31  ;;  %v653_v35 = vadd.f32 %v652_v33, %v364_v28  ;;  %v654_v36 = vpop.f32.mrb[5].mxu1 }
 0x18c   : > { %901 = vtanh.f32 %v464_v34  ;;  %v655_v37 = vadd.f32 %v654_v36, %v364_v28  ;;  %v519_v36 = vunpack.c.0.s8 %v518_v26 }
 0x18d   : > { %v884_v38 = vpop.eup %883  ;;  %903 = vtanh.f32 %v653_v35  ;;  %v511_v35 = vstv %s290_s19 }
 0x18e   : > { %v886_v39 = vpop.eup %885  ;;  %905 = vtanh.f32 %v655_v37  ;;  %v487_v46 = vmul.f32 %v884_v38, %v475_v41 }
 0x18f   : > { %v888_v40 = vpop.eup %887  ;;  %v488_v49 = vmul.f32 %v886_v39, %v475_v41 }
 0x190   : > { %v890_v42 = vpop.eup %889  ;;  %v663_v52 = vmul.f32 %v888_v40, %v475_v41 }
 0x191   : > { %v892_v43 = vpop.eup %891  ;;  %v664_v57 = vmul.f32 %v890_v42, %v475_v41 }
 0x192   : > { %v894_v45 = vpop.eup %893  ;;  %v489_v47 = vmul.f32 %v892_v43, %v480_v44 }
 0x193   : > { %v896_v48 = vpop.eup %895  ;;  %v490_v50 = vmul.f32 %v894_v45, %v480_v44 }
 0x194   : > { %v898_v51 = vpop.eup %897  ;;  %v493_v53 = vadd.f32 %v489_v47, %v487_v46  ;;  %v665_v54 = vmul.f32 %v896_v48, %v480_v44 }
 0x195   : > { %v900_v55 = vpop.eup %899  ;;  %v502_v58 = vadd.f32 %v490_v50, %v488_v49  ;;  %v666_v59 = vmul.f32 %v898_v51, %v480_v44  ;;  %v522_v44 = vsub.s32 %v519_v36, %v1107_v15 }
 0x196   : > { %v902_v60 = vpop.eup %901  ;;  %v669_v61 = vadd.f32 %v665_v54, %v663_v52  ;;  %v491_v62 = vmul.f32 %v900_v55, %v485_v56 }
 0x197   : > { %v904_v63 = vpop.eup %903  ;;  %v678_v0 = vadd.f32 %v666_v59, %v664_v57  ;;  %v492_v1 = vmul.f32 %v902_v60, %v485_v56 }
 0x198   : > { %v906_v2 = vpop.eup %905  ;;  %v494_v3 = vsel %vm376_vm0, %v491_v62, 0.0  ;;  %v667_v4 = vmul.f32 %v904_v63, %v485_v56 }
 0x199   : > { %v495_v5 = vadd.f32 %v494_v3, %v493_v53  ;;  %v503_v6 = vsel %vm376_vm0, %v492_v1, 0.0  ;;  %v668_v7 = vmul.f32 %v906_v2, %v485_v56 }
 0x19a   : > { %v670_v8 = vsel %vm376_vm0, %v667_v4, 0.0  ;;  %v504_v9 = vadd.f32 %v503_v6, %v502_v58 }
 0x19b   : > { %v496_v10 = vrot.slane %v495_v5, 4  ;;  %v671_v11 = vadd.f32 %v670_v8, %v669_v61  ;;  %v679_v12 = vsel %vm376_vm0, %v668_v7, 0.0 }
 0x19c   : > { %v505_v16 = vrot.slane %v504_v9, 4  ;;  %v680_v17 = vadd.f32 %v679_v12, %v678_v0 }
 0x19d   : > { %v497_v18 = vadd.f32 %v496_v10, %v495_v5  ;;  %v672_v19 = vrot.slane %v671_v11, 4 }
 0x19e   : > { %v506_v20 = vadd.f32 %v505_v16, %v504_v9  ;;  %v681_v21 = vrot.slane %v680_v17, 4 }
 0x19f   : > { %v498_v22 = vrot.slane %v497_v18, 2  ;;  %v673_v23 = vadd.f32 %v672_v19, %v671_v11 }
 0x1a0   : > { %v507_v13 = vrot.slane %v506_v20, 2  ;;  %v682_v24 = vadd.f32 %v681_v21, %v680_v17 }
 0x1a1   : > { %v499_v27 = vadd.f32 %v498_v22, %v497_v18  ;;  %v674_v28 = vrot.slane %v673_v23, 2 }
 0x1a2   : > { %v508_v29 = vadd.f32 %v507_v13, %v506_v20  ;;  %v683_v30 = vrot.slane %v682_v24, 2 }
 0x1a3   : > { %v675_v31 = vadd.f32 %v674_v28, %v673_v23  ;;  %v500_v32 = vrot.slane %v499_v27, 1 }
 0x1a4   : > { %v684_v33 = vadd.f32 %v683_v30, %v682_v24  ;;  %v509_v34 = vrot.slane %v508_v29, 1 }
 0x1a5   : > { %v501_v37 = vadd.f32 %v500_v32, %v499_v27  ;;  %v676_v38 = vrot.slane %v675_v31, 1 }
 0x1a6   : > { %v510_v39 = vadd.f32 %v509_v34, %v508_v29  ;;  %v685_v40 = vrot.slane %v684_v33, 1 }
 0x1a7   : > { %v512_v41 = vadd.f32 %v511_v35, %v501_v37  ;;  %v677_v42 = vadd.f32 %v676_v38, %v675_v31 }
 0x1a8   : > { %v513_v43 = vadd.f32 %v511_v35, %v510_v39  ;;  %v686_v45 = vadd.f32 %v685_v40, %v684_v33 }
 0x1a9   : > { %v687_v46 = vadd.f32 %v677_v42, %v511_v35 }
 0x1aa   : > { %v516_v47 = vcombine.low %v512_v41, %v513_v43  ;;  %v688_v48 = vadd.f32 %v686_v45, %v511_v35 }
 0x1ac   : > { %v523_v49 = vrot.slane %v516_v47, %v522_v44  ;;  %v691_v50 = vcombine.low %v687_v46, %v688_v48 }
 0x1ae   : > { %v530_v51 = vrot.slane %v523_v49, %v522_v44  ;;  %v698_v52 = vrot.slane %v691_v50, %v522_v44 }
 0x1b0   : > { %536 = vst.msk [vmem:[%s270_s23] sm:$0x3] %vm534_vm2, %v530_v51  ;;  %v705_v53 = vrot.slane %v698_v52, %v522_v44 }
 0x1b2   : > { %800 = vst.msk [vmem:[%s270_s23 + $0x2] sm:$0x3] %vm534_vm2, %v705_v53 }
 0x1b3   : > { %920 = shalt.err (!%p917_p3)
}
 0x1b4   : > { %s921_s17 = scalar_lea.hbm %s1150_s9, 64  ;;  %s925_s20 = scalar_lea.hbm %s1201_s7, 128 }
 0x1b5   : > { %p922_p4 = scmp.ne.s32.totalorder %s1150_s9, %s921_s17  ;;  %p926_p9 = scmp.lt.u32.totalorder %s1150_s9, %s1201_s7 }
 0x1b6   : > { %p927_p10 = scmp.lt.u32.totalorder %s925_s20, %s921_s17  ;;  %p929_p12 = scmp.lt.u32.totalorder %s921_s17, %s1150_s9 }
 0x1b7   : > { %p923_p7 = pnand %p922_p4, %p1056_p5 }
 0x1b8   : > { %p928_p11 = por %p927_p10, %p926_p9 }
 0x1b9   : > { %p924_p8 = pneg %p923_p7 }
 0x1ba   : > { %p930_p13 = por %p929_p12, %p928_p11 }
 0x1bc   : > { %p931_p0 = pnand %p930_p13, %p924_p8 }
 0x1be   : > { %934 = shalt.err (!%p931_p0)
}
 0x1bf   : > { %815 = dma.vmem_to_hbm [thread:$0]  (%p1056_p5), %s1152_s24, 64, %s1150_s9, %s710_s10  }
 0x1c0 PF: > { %p821_p1 = scmp.ge.s32.totalorder %s969_s29, 2  ;;  %s736_s23 = sand.u32 1, %s957_s26  }
 0x1c1   : > { %s737_s25 = scalar_lea.sflag [#allocation4], %s736_s23 }
 0x1c2   : > { %p818_p2 = pnand %p821_p1, %p1060_p6 }
 0x1c4   : > { %952 = dma.done.wait (!%p818_p2), %s737_s25, 64  }
 0x1c5   : > { %954 = vsyncadd (!%p818_p2), %s737_s25, 4294967232  ;;  %p18_p3 = scmp.ge.s32.totalorder %s1043_s8, 4   ;;  %s1204_s26 = smov %s961_s27 }
 0x1c6   : > { %s1205_s27 = smov %s965_s28  ;;  %s1206_s28 = smov %s1054_s11 }
 0x1c7   : > { %s1207_s29 = smov %s1043_s8  ;;  %20 = sbr.rel (!%p18_p3) target bundleno = 5 (0x5), region = 85 }
 0x1ce   :  { %742 = vsyncpa [#allocation4], 1 }
 0x1cf   :  { %744 = vsyncpa [#allocation4 + $0x1], 1 }

</bundles_post_ra>
